<compile_context>
chip_gen: v7x
topology: tpu7x:2x2x1
jax: 0.10.0
libtpu: 0.0.40
codegen_flags: <defaults>
</compile_context>

<pallas_src>
from functools import partial

import jax
import jax.numpy as jnp
from jax.experimental import pallas as pl
from jax.experimental.pallas import tpu as pltpu


def _round_up(x, m):
    return ((x + m - 1) // m) * m


def _conv_matmul_kernel(x_ref, w_ref, b_ref, o_ref):
    # x_ref: (T_TILE, CK_PAD)  bf16 im2col patch tile (aligned, lane-dense)
    # w_ref: (CK_PAD, C_OUT)   bf16 packed weight, resident across the grid
    # b_ref: (1, C_OUT)        f32 bias row, resident across the grid
    # o_ref: (T_TILE, C_OUT)   f32 output tile (lane-dense C_out last)
    acc = jnp.dot(x_ref[...], w_ref[...], preferred_element_type=jnp.float32)
    o_ref[...] = acc + b_ref[...]


def pack_conv1d_params(weight, bias, compute_dtype=jnp.bfloat16):
    """One-time packing of nn.Conv1d params for the Pallas kernel.

    weight: (C_out, C_in, K) f32 -> (CK_PAD, C_out) compute_dtype,
            row index = k*C_in + c, zero-padded rows CK..CK_PAD.
    bias:   (C_out,) f32 -> (1, C_out) f32.
    """
    C_out, C_in, K = weight.shape
    ck = C_in * K
    ck_pad = _round_up(ck, 128)
    w_col = jnp.transpose(weight, (2, 1, 0)).reshape(ck, C_out)
    w_col = jnp.pad(w_col, ((0, ck_pad - ck), (0, 0))).astype(compute_dtype)
    b_row = bias.reshape(1, C_out).astype(jnp.float32)
    return w_col, b_row


@partial(jax.jit, static_argnames=("k", "t_tile_max", "channels_last"))
def conv1d_pallas_packed(x, w_col, b_row, *, k, t_tile_max=512,
                         channels_last=False):
    """nn.Conv1d forward (stride=1, no padding) with pre-packed params.

    x:     (N, C_in, L) f32
    w_col: (CK_PAD, C_out) packed weight (see pack_conv1d_params)
    b_row: (1, C_out) f32
    returns (N, C_out, L_out) f32  (or (N, L_out, C_out) if channels_last)
    """
    N, C_in, L = x.shape
    ck_pad, C_out = w_col.shape
    ck = C_in * k
    L_out = L - k + 1
    M = N * L_out

    # ---- static tiling arithmetic ----
    # Aim for >=2 M-tiles so both TensorCores get work on v7x; tiles are
    # multiples of 8 sublanes, lane dims are multiples of 128 (or full dims).
    t_tile = min(t_tile_max, _round_up((M + 1) // 2, 8))
    m_pad = _round_up(M, t_tile)
    num_m = m_pad // t_tile

    # ---- wrapper-side im2col (cheap at this scale: M x CK ~= 35 KiB/batch) ----
    # x_nlc[n, l*C_in + c] = x[n, c, l]; window for output t is the contiguous
    # slice [t*C_in : t*C_in + K*C_in], so patches[m, k*C_in + c] matches w_col.
    x_nlc = jnp.transpose(x, (0, 2, 1)).reshape(N, L * C_in).astype(w_col.dtype)
    col_idx = (jnp.arange(L_out)[:, None] * C_in
               + jnp.arange(ck)[None, :])                    # (L_out, CK)
    patches = x_nlc[:, col_idx].reshape(M, ck)               # (M, CK)
    patches = jnp.pad(patches, ((0, m_pad - M), (0, ck_pad - ck)))

    out = pl.pallas_call(
        _conv_matmul_kernel,
        out_shape=jax.ShapeDtypeStruct((m_pad, C_out), jnp.float32),
        grid=(num_m,),
        in_specs=[
            pl.BlockSpec((t_tile, ck_pad), lambda i: (i, 0)),
            pl.BlockSpec((ck_pad, C_out), lambda i: (0, 0)),   # resident weight
            pl.BlockSpec((1, C_out), lambda i: (0, 0)),        # resident bias
        ],
        out_specs=pl.BlockSpec((t_tile, C_out), lambda i: (i, 0)),
        compiler_params=pltpu.CompilerParams(
            dimension_semantics=("parallel",)),
    )(patches, w_col, b_row)

    out_nlc = out[:M, :].reshape(N, L_out, C_out)
    if channels_last:
        return out_nlc                                  # lane-dense, no transpose
    # Match PyTorch nn.Conv1d layout (N, C_out, L_out).
    return jnp.transpose(out_nlc, (0, 2, 1))


class CNNNetPallas:
    """JAX/Pallas port of CNN_Net.  Only conv1 participates in forward()."""

    def __init__(self, key, compute_dtype=jnp.bfloat16):
        C_in, C_out, K = 8, 256, 120
        k1, k2 = jax.random.split(key)
        # PyTorch-style uniform init: U(-1/sqrt(fan_in), 1/sqrt(fan_in))
        fan_in = C_in * K
        bound = 1.0 / jnp.sqrt(jnp.float32(fan_in))
        self.conv1_w = jax.random.uniform(
            k1, (C_out, C_in, K), jnp.float32, -bound, bound)
        self.conv1_b = jax.random.uniform(
            k2, (C_out,), jnp.float32, -bound, bound)
        self.K = K
        # Packed once at init (perf: no per-call transpose/pad/cast, halves
        # per-call HBM traffic; bf16 halves the dominant weight DMA).
        self.w_col, self.b_row = pack_conv1d_params(
            self.conv1_w, self.conv1_b, compute_dtype)
        # TODO(synk): self.pool (MaxPool2d) and self.fc1 (Linear) are defined in
        # __init__ but never used in forward(); intentionally not implemented.

    def __call__(self, x, channels_last=False):
        return conv1d_pallas_packed(x, self.w_col, self.b_row, k=self.K,
                                    channels_last=channels_last)


if __name__ == "__main__":
    key = jax.random.PRNGKey(0)
    kp, kx = jax.random.split(key)

    net = CNNNetPallas(kp)

    # Input consistent with nn.Conv1d(8, 256, 120): (N, C_in=8, L=128).
    N, C_in, L = 2, 8, 128
    K = 120
    L_out = L - K + 1
    x = jax.random.normal(kx, (N, C_in, L), dtype=jnp.float32)

    out = jax.block_until_ready(net(x))
    assert out.shape == (N, 256, L_out), out.shape

    # Tight check: reference with the same bf16-rounded inputs, f32 accumulate.
    x_q = x.astype(jnp.bfloat16).astype(jnp.float32)
    w_q = net.conv1_w.astype(jnp.bfloat16).astype(jnp.float32)
    ref_q = jax.lax.conv_general_dilated(
        x_q, w_q, window_strides=(1,), padding="VALID",
        dimension_numbers=("NCH", "OIH", "NCH"),
        precision=jax.lax.Precision.HIGHEST,
    ) + net.conv1_b[None, :, None]
    err_q = float(jnp.max(jnp.abs(out - ref_q)))
    assert jnp.allclose(out, ref_q, atol=2e-3, rtol=2e-3), err_q

    # Loose sanity check against the full-f32 reference (bf16 inputs change
    # numerics by ~1e-3..1e-2 over the 960-term accumulation).
    ref = jax.lax.conv_general_dilated(
        x, net.conv1_w, window_strides=(1,), padding="VALID",
        dimension_numbers=("NCH", "OIH", "NCH"),
        precision=jax.lax.Precision.HIGHEST,
    ) + net.conv1_b[None, :, None]
    err = float(jnp.max(jnp.abs(out - ref)))
    assert jnp.allclose(out, ref, atol=5e-2, rtol=5e-2), err

    print("KERNEL_OK")
</pallas_src>

<mosaic_0001>
module attributes {stable_mosaic.version = 11 : i64} {
  func.func @_conv_matmul_kernel(%arg0: i32, %arg1: memref<16x1024xbf16, #tpu.memory_space<vmem>>, %arg2: memref<1024x256xbf16, #tpu.memory_space<vmem>>, %arg3: memref<1x256xf32, #tpu.memory_space<vmem>>, %arg4: memref<16x256xf32, #tpu.memory_space<vmem>>) attributes {dimension_semantics = [#tpu.dimension_semantics<parallel>], iteration_bounds = array<i64: 2>, scalar_prefetch = 0 : i64, scratch_operands = 0 : i64, tpu.core_type = #tpu.core_type<tc>, window_params = [{transform_indices = @transform_0, window_bounds = array<i64: 16, 1024>}, {pipeline_mode = #tpu.pipeline_mode<synchronous>, transform_indices = @transform_1, window_bounds = array<i64: 1024, 256>}, {pipeline_mode = #tpu.pipeline_mode<synchronous>, transform_indices = @transform_2, window_bounds = array<i64: 1, 256>}, {transform_indices = @transform_3, window_bounds = array<i64: 16, 256>}]} {
    %c0 = arith.constant 0 : index
    %c0_0 = arith.constant 0 : index
    %0 = vector.load %arg1[%c0, %c0_0] : memref<16x1024xbf16, #tpu.memory_space<vmem>>, vector<16x1024xbf16>
    %c0_1 = arith.constant 0 : index
    %c0_2 = arith.constant 0 : index
    %1 = vector.load %arg2[%c0_1, %c0_2] : memref<1024x256xbf16, #tpu.memory_space<vmem>>, vector<1024x256xbf16>
    %cst = arith.constant dense<0.000000e+00> : vector<16x256xf32>
    %2 = tpu.matmul %0, %1, %cst {dimension_numbers = #tpu.dot_dimension_numbers<[1], [0], [0], [1], [0, 0, 1, 1], [], []>} : vector<16x1024xbf16>, vector<1024x256xbf16>, vector<16x256xf32> -> vector<16x256xf32>
    %c0_3 = arith.constant 0 : index
    %c0_4 = arith.constant 0 : index
    %3 = vector.load %arg3[%c0_3, %c0_4] : memref<1x256xf32, #tpu.memory_space<vmem>>, vector<1x256xf32>
    %4 = vector.broadcast %3 : vector<1x256xf32> to vector<16x256xf32>
    %5 = arith.addf %2, %4 : vector<16x256xf32>
    %c0_5 = arith.constant 0 : index
    %c0_6 = arith.constant 0 : index
    %6 = vector.load %arg4[%c0_5, %c0_6] : memref<16x256xf32, #tpu.memory_space<vmem>>, vector<16x256xf32>
    tpu.vector_store %arg4[%c0_5, %c0_6], %5 {strides = array<i32>} : memref<16x256xf32, #tpu.memory_space<vmem>>, vector<16x256xf32>,
    return
  }
  func.func @transform_0(%arg0: i32) -> (i32, i32) {
    %c0_i32 = arith.constant 0 : i32
    %c0_i32_0 = arith.constant 0 : i32
    return %arg0, %c0_i32 : i32, i32
  }
  func.func @transform_1(%arg0: i32) -> (i32, i32) {
    %c0_i32 = arith.constant 0 : i32
    %c0_i32_0 = arith.constant 0 : i32
    %c0_i32_1 = arith.constant 0 : i32
    return %c0_i32, %c0_i32_0 : i32, i32
  }
  func.func @transform_2(%arg0: i32) -> (i32, i32) {
    %c0_i32 = arith.constant 0 : i32
    %c0_i32_0 = arith.constant 0 : i32
    %c0_i32_1 = arith.constant 0 : i32
    return %c0_i32, %c0_i32_0 : i32, i32
  }
  func.func @transform_3(%arg0: i32) -> (i32, i32) {
    %c0_i32 = arith.constant 0 : i32
    %c0_i32_0 = arith.constant 0 : i32
    return %arg0, %c0_i32 : i32, i32
  }
}

</mosaic_0001>

<bundles_post_ra>
// kernel: conv1d_pallas_packed.1
= control target key start
LH: loop header
LB: loop body
LE: loop exit
PB: predicated region body
PF: predicated region fallthrough
CT: control target
= control target key end

     0   :  { %s1636_s12 = smov 0   ;;  %s2072_s0 = inlined_call_operand.vmem [shape: bf16[32,1024], index: 0, kind: input, shape index: {}]   ;;  %s2073_s1 = inlined_call_operand.vmem [shape: bf16[1024,256], index: 1, kind: input, shape index: {}]   ;;  %s2074_s2 = inlined_call_operand.vmem [shape: f32[1,256], index: 2, kind: input, shape index: {}]   ;;  %s2075_s3 = inlined_call_operand.vmem [shape: f32[32,256], index: 3, kind: output, shape index: {}]  }
   0x1 LB: > { %s1241_s13 = sadd.s32 4294967295, %s1614_s12   ;;  %p1245_p0 = scmp.ge.s32.totalorder %s1614_s12, 1  ;;  %s1614_s12 = sphi %s1636_s12, %s13_s12  }
   0x2   : > { %p139_p1 = scmp.lt.s32.totalorder %s1614_s12, 3 }
   0x4   : > { %p140_p2 = pnand %p1245_p0, %p139_p1 }
   0x5   : > { %v1416_v0 = vld [vmem:[%s2073_s1 + $0x4] ss:$8 sps:$4 sm:$0xff] (!%p140_p2)   ;;  %v1420_v2 = vld [vmem:[%s2073_s1] ss:$8 sps:$4 sm:$0xff] (!%p140_p2)   ;;  %v1422_v4 = vld [vmem:[%s2073_s1 + $0x14] ss:$8 sps:$4 sm:$0xff] (!%p140_p2)  }
   0x6   : > { %143 = sbr.rel (%p140_p2) target bundleno = 354 (0x162), region = 32  ;;  %v1418_v1 = vld [vmem:[%s2073_s1 + $0x204] ss:$8 sps:$4 sm:$0xff] (!%p140_p2)   ;;  %1007 = vmatprep.subr.bf16.mxu1 (!%p140_p2), %v1416_v0  ;;  %v1421_v3 = vld [vmem:[%s2073_s1 + $0x200] ss:$8 sps:$4 sm:$0xff] (!%p140_p2)   ;;  %s1246_s24 = sshll.u32 (!%p140_p2), %s1241_s13, 1 }
   0x7   : > { %1093 = vmatprep.subr.bf16.mxu0 (!%p140_p2), %v1418_v1  ;;  %1008 = vmatpush1.bf16.msra.mxu1 (!%p140_p2), %v1420_v2  ;;  %v1424_v5 = vld [vmem:[%s2073_s1 + $0x214] ss:$8 sps:$4 sm:$0xff] (!%p140_p2)   ;;  %v1426_v6 = vld [vmem:[%s2073_s1 + $0x10] ss:$8 sps:$4 sm:$0xff] (!%p140_p2)   ;;  %v1428_v8 = vld [vmem:[%s2073_s1 + $0x24] ss:$8 sps:$4 sm:$0xff] (!%p140_p2)  }
   0x8   : > { %1094 = vmatpush1.bf16.msra.mxu0 (!%p140_p2), %v1421_v3  ;;  %1009 = vmatprep.subr.bf16.mxu1 (!%p140_p2), %v1422_v4  ;;  %v1427_v7 = vld [vmem:[%s2073_s1 + $0x210] ss:$8 sps:$4 sm:$0xff] (!%p140_p2)   ;;  %v1430_v9 = vld [vmem:[%s2073_s1 + $0x224] ss:$8 sps:$4 sm:$0xff] (!%p140_p2)   ;;  %v1432_v10 = vld [vmem:[%s2073_s1 + $0x20] ss:$8 sps:$4 sm:$0xff] (!%p140_p2)  }
   0x9   : > { %1095 = vmatprep.subr.bf16.mxu0 (!%p140_p2), %v1424_v5  ;;  %v1433_v11 = vld [vmem:[%s2073_s1 + $0x220] ss:$8 sps:$4 sm:$0xff] (!%p140_p2)   ;;  %v1434_v12 = vld [vmem:[%s2073_s1 + $0x34] ss:$8 sps:$4 sm:$0xff] (!%p140_p2)   ;;  %v1438_v14 = vld [vmem:[%s2073_s1 + $0x30] ss:$8 sps:$4 sm:$0xff] (!%p140_p2)  }
   0xa   : > { %v1436_v13 = vld [vmem:[%s2073_s1 + $0x234] ss:$8 sps:$4 sm:$0xff] (!%p140_p2)   ;;  %v1439_v15 = vld [vmem:[%s2073_s1 + $0x230] ss:$8 sps:$4 sm:$0xff] (!%p140_p2)   ;;  %v1440_v16 = vld [vmem:[%s2073_s1 + $0x44] ss:$8 sps:$4 sm:$0xff] (!%p140_p2)  }
   0xb   : > { %1010 = vmatpush1.bf16.msra.mxu1 (!%p140_p2), %v1426_v6  ;;  %v1442_v17 = vld [vmem:[%s2073_s1 + $0x244] ss:$8 sps:$4 sm:$0xff] (!%p140_p2)   ;;  %v1444_v18 = vld [vmem:[%s2073_s1 + $0x40] ss:$8 sps:$4 sm:$0xff] (!%p140_p2)   ;;  %v1446_v20 = vld [vmem:[%s2073_s1 + $0x54] ss:$8 sps:$4 sm:$0xff] (!%p140_p2)  }
   0xc   : > { %1096 = vmatpush1.bf16.msra.mxu0 (!%p140_p2), %v1427_v7  ;;  %1011 = vmatprep.subr.bf16.mxu1 (!%p140_p2), %v1428_v8  ;;  %v1445_v19 = vld [vmem:[%s2073_s1 + $0x240] ss:$8 sps:$4 sm:$0xff] (!%p140_p2)   ;;  %v1448_v21 = vld [vmem:[%s2073_s1 + $0x254] ss:$8 sps:$4 sm:$0xff] (!%p140_p2)   ;;  %v1450_v22 = vld [vmem:[%s2073_s1 + $0x50] ss:$8 sps:$4 sm:$0xff] (!%p140_p2)  }
   0xd   : > { %1097 = vmatprep.subr.bf16.mxu0 %v1430_v9  ;;  %v1451_v23 = vld [vmem:[%s2073_s1 + $0x250] ss:$8 sps:$4 sm:$0xff]   ;;  %v1452_v24 = vld [vmem:[%s2073_s1 + $0x64] ss:$8 sps:$4 sm:$0xff]   ;;  %v1456_v26 = vld [vmem:[%s2073_s1 + $0x60] ss:$8 sps:$4 sm:$0xff]  }
   0xe   : > { %v1454_v25 = vld [vmem:[%s2073_s1 + $0x264] ss:$8 sps:$4 sm:$0xff]   ;;  %v1457_v27 = vld [vmem:[%s2073_s1 + $0x260] ss:$8 sps:$4 sm:$0xff]   ;;  %v1458_v28 = vld [vmem:[%s2073_s1 + $0x74] ss:$8 sps:$4 sm:$0xff]  }
   0xf   : > { %1012 = vmatpush1.bf16.msra.mxu1 %v1432_v10  ;;  %v1460_v29 = vld [vmem:[%s2073_s1 + $0x274] ss:$8 sps:$4 sm:$0xff]   ;;  %v1462_v30 = vld [vmem:[%s2073_s1 + $0x70] ss:$8 sps:$4 sm:$0xff]   ;;  %v1464_v32 = vld [vmem:[%s2073_s1 + $0x84] ss:$8 sps:$4 sm:$0xff]  }
  0x10   : > { %1098 = vmatpush1.bf16.msra.mxu0 %v1433_v11  ;;  %1013 = vmatprep.subr.bf16.mxu1 %v1434_v12  ;;  %v1463_v31 = vld [vmem:[%s2073_s1 + $0x270] ss:$8 sps:$4 sm:$0xff]   ;;  %p166_p3 = scmp.lt.s32.totalorder %s1246_s24, 3  ;;  %v1466_v33 = vld [vmem:[%s2073_s1 + $0x284] ss:$8 sps:$4 sm:$0xff]  }
  0x11   : > { %1099 = vmatprep.subr.bf16.mxu0 %v1436_v13  ;;  %v1468_v34 = vld [vmem:[%s2073_s1 + $0x80] ss:$8 sps:$4 sm:$0xff]   ;;  %v1470_v36 = vld [vmem:[%s2073_s1 + $0x94] ss:$8 sps:$4 sm:$0xff]   ;;  %v1474_v38 = vld [vmem:[%s2073_s1 + $0x90] ss:$8 sps:$4 sm:$0xff]  }
  0x12   : > { %v1469_v35 = vld [vmem:[%s2073_s1 + $0x280] ss:$8 sps:$4 sm:$0xff]   ;;  %s2077_s24 = smov (!%p166_p3, %s1246_s24), 3  ;;  %v1472_v37 = vld [vmem:[%s2073_s1 + $0x294] ss:$8 sps:$4 sm:$0xff]  }
  0x13   : > { %1014 = vmatpush1.bf16.msra.mxu1 %v1438_v14  ;;  %v1475_v39 = vld [vmem:[%s2073_s1 + $0x290] ss:$8 sps:$4 sm:$0xff]   ;;  %v1476_v40 = vld [vmem:[%s2073_s1 + $0xa4] ss:$8 sps:$4 sm:$0xff]   ;;  %s1390_s21 = sshll.u32 %s2077_s24, 5  ;;  %s1391_s30 = sshll.u32 %s2077_s24, 4 }
  0x14   : > { %1100 = vmatpush1.bf16.msra.mxu0 %v1439_v15  ;;  %1015 = vmatprep.subr.bf16.mxu1 %v1440_v16  ;;  %v1478_v41 = vld [vmem:[%s2073_s1 + $0x2a4] ss:$8 sps:$4 sm:$0xff]   ;;  %v1480_v42 = vld [vmem:[%s2073_s1 + $0xa0] ss:$8 sps:$4 sm:$0xff]   ;;  %s1784_s4 = scalar_lea.vmem %s2072_s0, %s1390_s21  ;;  %v1482_v44 = vld [vmem:[%s2073_s1 + $0xb4] ss:$8 sps:$4 sm:$0xff]  }
  0x15   : > { %1101 = vmatprep.subr.bf16.mxu0 %v1442_v17  ;;  %v1481_v43 = vld [vmem:[%s2073_s1 + $0x2a0] ss:$8 sps:$4 sm:$0xff]   ;;  %v1484_v45 = vld [vmem:[%s2073_s1 + $0x2b4] ss:$8 sps:$4 sm:$0xff]   ;;  %v1486_v46 = vld [vmem:[%s2073_s1 + $0xb0] ss:$8 sps:$4 sm:$0xff]  }
  0x16   : > { %v1487_v47 = vld [vmem:[%s2073_s1 + $0x2b0] ss:$8 sps:$4 sm:$0xff]   ;;  %v179_v48 = vld [vmem:[%s1784_s4] sm:$0xff]  ;;  %v1494_v58 = vld [vmem:[%s2073_s1 + $0xd4] ss:$8 sps:$4 sm:$0xff]  }
  0x17   : > { %1016 = vmatpush1.bf16.msra.mxu1 %v1444_v18  ;;  %v183_v49 = vld [vmem:[%s1784_s4 + $0x20] sm:$0xff]  ;;  %v181_v53 = vld [vmem:[%s1784_s4 + $0x10] sm:$0xff] }
  0x18   : > { %1102 = vmatpush1.bf16.msra.mxu0 %v1445_v19  ;;  %1017 = vmatprep.subr.bf16.mxu1 %v1446_v20  ;;  %v1488_v50 = vld [vmem:[%s2073_s1 + $0xc4] ss:$8 sps:$4 sm:$0xff]   ;;  %v1253_v52 = vcombine.high %v179_v48, %v183_v49  ;;  %v185_v54 = vld [vmem:[%s1784_s4 + $0x30] sm:$0xff]  ;;  %v1492_v56 = vld [vmem:[%s2073_s1 + $0xc0] ss:$8 sps:$4 sm:$0xff]   ;;  %v1252_v8 = vcombine.low %v179_v48, %v183_v49 }
  0x19   : > { %1103 = vmatprep.subr.bf16.mxu0 %v1448_v21  ;;  %v1490_v51 = vld [vmem:[%s2073_s1 + $0x2c4] ss:$8 sps:$4 sm:$0xff]   ;;  %v1257_v55 = vcombine.high %v181_v53, %v185_v54  ;;  %v1493_v57 = vld [vmem:[%s2073_s1 + $0x2c0] ss:$8 sps:$4 sm:$0xff]   ;;  %v1496_v59 = vld [vmem:[%s2073_s1 + $0x2d4] ss:$8 sps:$4 sm:$0xff]   ;;  %v1256_v10 = vcombine.low %v181_v53, %v185_v54 }
  0x1a   : > { %1039 = vmatprep.mubr.bf16.mxu1 %v1253_v52  ;;  %v1498_v60 = vld [vmem:[%s2073_s1 + $0xd0] ss:$8 sps:$4 sm:$0xff]   ;;  %v1500_v62 = vld [vmem:[%s2073_s1 + $0xe4] ss:$8 sps:$4 sm:$0xff]   ;;  %v1504_v0 = vld [vmem:[%s2073_s1 + $0xe0] ss:$8 sps:$4 sm:$0xff]  }
  0x1b   : > { %1018 = vmatpush1.bf16.msra.mxu1 %v1450_v22  ;;  %1125 = vmatprep.mubr.bf16.mxu0 %v1257_v55  ;;  %v1499_v61 = vld [vmem:[%s2073_s1 + $0x2d0] ss:$8 sps:$4 sm:$0xff]   ;;  %v1502_v63 = vld [vmem:[%s2073_s1 + $0x2e4] ss:$8 sps:$4 sm:$0xff]   ;;  %v1505_v1 = vld [vmem:[%s2073_s1 + $0x2e0] ss:$8 sps:$4 sm:$0xff]  }
  0x1c   : > { %1104 = vmatpush1.bf16.msra.mxu0 %v1451_v23  ;;  %1019 = vmatprep.subr.bf16.mxu1 %v1452_v24  ;;  %v1506_v2 = vld [vmem:[%s2073_s1 + $0xf4] ss:$8 sps:$4 sm:$0xff]   ;;  %v1510_v4 = vld [vmem:[%s2073_s1 + $0xf0] ss:$8 sps:$4 sm:$0xff]   ;;  %v1514_v6 = vld [vmem:[%s2073_s1 + $0x104] ss:$8 sps:$4 sm:$0xff]  }
  0x1d   : > { %1105 = vmatprep.subr.bf16.mxu0 %v1454_v25  ;;  %v1508_v3 = vld [vmem:[%s2073_s1 + $0x2f4] ss:$8 sps:$4 sm:$0xff]   ;;  %v1511_v5 = vld [vmem:[%s2073_s1 + $0x2f0] ss:$8 sps:$4 sm:$0xff]   ;;  %v1517_v7 = vld [vmem:[%s2073_s1 + $0x304] ss:$8 sps:$4 sm:$0xff]  }
  0x1e   : > { %v1512_v9 = vld [vmem:[%s2073_s1 + $0x100] ss:$8 sps:$4 sm:$0xff]   ;;  %v1520_v12 = vld [vmem:[%s2073_s1 + $0x114] ss:$8 sps:$4 sm:$0xff]   ;;  %v1518_v14 = vld [vmem:[%s2073_s1 + $0x110] ss:$8 sps:$4 sm:$0xff]  }
  0x1f   : > { %1020 = vmatpush1.bf16.msra.mxu1 %v1456_v26  ;;  %v1515_v11 = vld [vmem:[%s2073_s1 + $0x300] ss:$8 sps:$4 sm:$0xff]   ;;  %v1523_v13 = vld [vmem:[%s2073_s1 + $0x314] ss:$8 sps:$4 sm:$0xff]   ;;  %v1521_v15 = vld [vmem:[%s2073_s1 + $0x310] ss:$8 sps:$4 sm:$0xff]  }
  0x20   : > { %1106 = vmatpush1.bf16.msra.mxu0 %v1457_v27  ;;  %1021 = vmatprep.subr.bf16.mxu1 %v1458_v28  ;;  %v1526_v16 = vld [vmem:[%s2073_s1 + $0x124] ss:$8 sps:$4 sm:$0xff]   ;;  %v1524_v18 = vld [vmem:[%s2073_s1 + $0x120] ss:$8 sps:$4 sm:$0xff]   ;;  %v1532_v20 = vld [vmem:[%s2073_s1 + $0x134] ss:$8 sps:$4 sm:$0xff]  }
  0x21   : > { %1107 = vmatprep.subr.bf16.mxu0 %v1460_v29  ;;  %v1529_v17 = vld [vmem:[%s2073_s1 + $0x324] ss:$8 sps:$4 sm:$0xff]   ;;  %v1527_v19 = vld [vmem:[%s2073_s1 + $0x320] ss:$8 sps:$4 sm:$0xff]   ;;  %v1535_v21 = vld [vmem:[%s2073_s1 + $0x334] ss:$8 sps:$4 sm:$0xff]  }
  0x22   : > { %v1530_v22 = vld [vmem:[%s2073_s1 + $0x130] ss:$8 sps:$4 sm:$0xff]   ;;  %v1538_v24 = vld [vmem:[%s2073_s1 + $0x144] ss:$8 sps:$4 sm:$0xff]   ;;  %v1536_v26 = vld [vmem:[%s2073_s1 + $0x140] ss:$8 sps:$4 sm:$0xff]  }
  0x23   : > { %1022 = vmatpush1.bf16.msra.mxu1 %v1462_v30  ;;  %v1533_v23 = vld [vmem:[%s2073_s1 + $0x330] ss:$8 sps:$4 sm:$0xff]   ;;  %v1541_v25 = vld [vmem:[%s2073_s1 + $0x344] ss:$8 sps:$4 sm:$0xff]   ;;  %v1539_v27 = vld [vmem:[%s2073_s1 + $0x340] ss:$8 sps:$4 sm:$0xff]  }
  0x24   : > { %1108 = vmatpush1.bf16.msra.mxu0 %v1463_v31  ;;  %1023 = vmatprep.subr.bf16.mxu1 %v1464_v32  ;;  %v1544_v28 = vld [vmem:[%s2073_s1 + $0x154] ss:$8 sps:$4 sm:$0xff]   ;;  %v1542_v30 = vld [vmem:[%s2073_s1 + $0x150] ss:$8 sps:$4 sm:$0xff]   ;;  %v1550_v32 = vld [vmem:[%s2073_s1 + $0x164] ss:$8 sps:$4 sm:$0xff]  }
  0x25   : > { %1109 = vmatprep.subr.bf16.mxu0 %v1466_v33  ;;  %v1547_v29 = vld [vmem:[%s2073_s1 + $0x354] ss:$8 sps:$4 sm:$0xff]   ;;  %v1545_v31 = vld [vmem:[%s2073_s1 + $0x350] ss:$8 sps:$4 sm:$0xff]   ;;  %v1553_v33 = vld [vmem:[%s2073_s1 + $0x364] ss:$8 sps:$4 sm:$0xff]  }
  0x26   : > { %v1560_v48 = vld [vmem:[%s2073_s1 + $0x180] ss:$8 sps:$4 sm:$0xff]   ;;  %v1566_v52 = vld [vmem:[%s2073_s1 + $0x190] ss:$8 sps:$4 sm:$0xff]   ;;  %v1574_v54 = vld [vmem:[%s2073_s1 + $0x1a4] ss:$8 sps:$4 sm:$0xff]  }
  0x27   : > { %1024 = vmatpush1.bf16.msra.mxu1 %v1468_v34  ;;  %v1929_v34 = vld [vmem:[%s1784_s4 + $0x8] sm:$0xff]  ;;  %v1569_v53 = vld [vmem:[%s2073_s1 + $0x390] ss:$8 sps:$4 sm:$0xff]  }
  0x28   : > { %1110 = vmatpush1.bf16.msra.mxu0 %v1469_v35  ;;  %1025 = vmatprep.subr.bf16.mxu1 %v1470_v36  ;;  %v1932_v35 = vld [vmem:[%s1784_s4 + $0x28] sm:$0xff]  ;;  %v1935_v36 = vld [vmem:[%s1784_s4 + $0x18] sm:$0xff] }
  0x29   : > { %1111 = vmatprep.subr.bf16.mxu0 %v1472_v37  ;;  %v1938_v37 = vld [vmem:[%s1784_s4 + $0x38] sm:$0xff]  ;;  %v1563_v49 = vld [vmem:[%s2073_s1 + $0x380] ss:$8 sps:$4 sm:$0xff]   ;;  %v1577_v55 = vld [vmem:[%s2073_s1 + $0x3a4] ss:$8 sps:$4 sm:$0xff]   ;;  %s177_s4 = scalar_lea.vmem %s2075_s3, %s1391_s30 }
  0x2b   : > { %1026 = vmatpush1.bf16.msra.mxu1 %v1474_v38  ;;  %v1548_v38 = vld [vmem:[%s2073_s1 + $0x160] ss:$8 sps:$4 sm:$0xff]  }
  0x2c   : > { %1112 = vmatpush1.bf16.msra.mxu0 %v1475_v39  ;;  %1027 = vmatprep.subr.bf16.mxu1 %v1476_v40  ;;  %v1551_v39 = vld [vmem:[%s2073_s1 + $0x360] ss:$8 sps:$4 sm:$0xff]   ;;  %v1255_v40 = vcombine.high %v1929_v34, %v1932_v35 }
  0x2d   : > { %1113 = vmatprep.subr.bf16.mxu0 %v1478_v41  ;;  %v1556_v41 = vld [vmem:[%s2073_s1 + $0x174] ss:$8 sps:$4 sm:$0xff]  }
  0x2f   : > { %1028 = vmatpush1.bf16.msra.mxu1 %v1480_v42  ;;  %v1559_v42 = vld [vmem:[%s2073_s1 + $0x374] ss:$8 sps:$4 sm:$0xff]  }
  0x30   : > { %1114 = vmatpush1.bf16.msra.mxu0 %v1481_v43  ;;  %1029 = vmatprep.subr.bf16.mxu1 %v1482_v44  ;;  %v1259_v43 = vcombine.high %v1935_v36, %v1938_v37  ;;  %v1554_v44 = vld [vmem:[%s2073_s1 + $0x170] ss:$8 sps:$4 sm:$0xff]  }
  0x31   : > { %1115 = vmatprep.subr.bf16.mxu0 %v1484_v45  ;;  %v1557_v45 = vld [vmem:[%s2073_s1 + $0x370] ss:$8 sps:$4 sm:$0xff]  }
  0x33   : > { %1030 = vmatpush1.bf16.msra.mxu1 %v1486_v46  ;;  %v1562_v46 = vld [vmem:[%s2073_s1 + $0x184] ss:$8 sps:$4 sm:$0xff]  }
  0x34   : > { %1116 = vmatpush1.bf16.msra.mxu0 %v1487_v47  ;;  %1031 = vmatprep.subr.bf16.mxu1 %v1488_v50  ;;  %v1565_v47 = vld [vmem:[%s2073_s1 + $0x384] ss:$8 sps:$4 sm:$0xff]   ;;  %v1568_v50 = vld [vmem:[%s2073_s1 + $0x194] ss:$8 sps:$4 sm:$0xff]  }
  0x35   : > { %1117 = vmatprep.subr.bf16.mxu0 %v1490_v51  ;;  %v1571_v51 = vld [vmem:[%s2073_s1 + $0x394] ss:$8 sps:$4 sm:$0xff]  }
  0x37   : > { %1032 = vmatpush1.bf16.msra.mxu1 %v1492_v56  ;;  %v1572_v56 = vld [vmem:[%s2073_s1 + $0x1a0] ss:$8 sps:$4 sm:$0xff]  }
  0x38   : > { %1118 = vmatpush1.bf16.msra.mxu0 %v1493_v57  ;;  %1033 = vmatprep.subr.bf16.mxu1 %v1494_v58  ;;  %v1575_v57 = vld [vmem:[%s2073_s1 + $0x3a0] ss:$8 sps:$4 sm:$0xff]   ;;  %v1580_v58 = vld [vmem:[%s2073_s1 + $0x1b4] ss:$8 sps:$4 sm:$0xff]  }
  0x39   : > { %1119 = vmatprep.subr.bf16.mxu0 %v1496_v59  ;;  %v1583_v59 = vld [vmem:[%s2073_s1 + $0x3b4] ss:$8 sps:$4 sm:$0xff]  }
  0x3b   : > { %1034 = vmatpush1.bf16.msra.mxu1 %v1498_v60  ;;  %v1578_v60 = vld [vmem:[%s2073_s1 + $0x1b0] ss:$8 sps:$4 sm:$0xff]  }
  0x3c   : > { %1120 = vmatpush1.bf16.msra.mxu0 %v1499_v61  ;;  %1035 = vmatprep.subr.bf16.mxu1 %v1500_v62  ;;  %v1581_v61 = vld [vmem:[%s2073_s1 + $0x3b0] ss:$8 sps:$4 sm:$0xff]   ;;  %v1586_v62 = vld [vmem:[%s2073_s1 + $0x1c4] ss:$8 sps:$4 sm:$0xff]  }
  0x3d   : > { %1121 = vmatprep.subr.bf16.mxu0 %v1502_v63  ;;  %v1589_v63 = vld [vmem:[%s2073_s1 + $0x3c4] ss:$8 sps:$4 sm:$0xff]  }
  0x3f   : > { %1036 = vmatpush1.bf16.msra.mxu1 %v1504_v0  ;;  %v1584_v0 = vld [vmem:[%s2073_s1 + $0x1c0] ss:$8 sps:$4 sm:$0xff]  }
  0x40   : > { %1122 = vmatpush1.bf16.msra.mxu0 %v1505_v1  ;;  %1037 = vmatprep.subr.bf16.mxu1 %v1506_v2  ;;  %v1587_v1 = vld [vmem:[%s2073_s1 + $0x3c0] ss:$8 sps:$4 sm:$0xff]   ;;  %v1592_v2 = vld [vmem:[%s2073_s1 + $0x1d4] ss:$8 sps:$4 sm:$0xff]  }
  0x41   : > { %1123 = vmatprep.subr.bf16.mxu0 %v1508_v3  ;;  %v1595_v3 = vld [vmem:[%s2073_s1 + $0x3d4] ss:$8 sps:$4 sm:$0xff]  }
  0x43   : > { %1038 = vmatpush1.bf16.msra.mxu1 %v1510_v4  ;;  %v1590_v4 = vld [vmem:[%s2073_s1 + $0x1d0] ss:$8 sps:$4 sm:$0xff]  }
  0x44   : > { %1124 = vmatpush1.bf16.msra.mxu0 %v1511_v5  ;;  %1050 = vmatprep.subr.bf16.mxu1 %v1514_v6  ;;  %v1593_v5 = vld [vmem:[%s2073_s1 + $0x3d0] ss:$8 sps:$4 sm:$0xff]   ;;  %v1598_v6 = vld [vmem:[%s2073_s1 + $0x1e4] ss:$8 sps:$4 sm:$0xff]  }
  0x45   : > { %1136 = vmatprep.subr.bf16.mxu0 %v1517_v7  ;;  %v1601_v7 = vld [vmem:[%s2073_s1 + $0x3e4] ss:$8 sps:$4 sm:$0xff]  }
  0x46   : > { %1040 = vmatmul.mubr.bf16.vlgmr.msra.gmra.mrb[0].mxu1 %v1252_v8  ;;  %v1596_v8 = vld [vmem:[%s2073_s1 + $0x1e0] ss:$8 sps:$4 sm:$0xff]  }
  0x47   : > { %1126 = vmatmul.mubr.bf16.vlgmr.msra.gmra.mrb[0].mxu0 %v1256_v10  ;;  %1051 = vmatpush1.bf16.msra.mxu1 %v1512_v9  ;;  %v1599_v9 = vld [vmem:[%s2073_s1 + $0x3e0] ss:$8 sps:$4 sm:$0xff]   ;;  %v1604_v10 = vld [vmem:[%s2073_s1 + $0x1f4] ss:$8 sps:$4 sm:$0xff]  }
  0x48   : > { %1137 = vmatpush1.bf16.msra.mxu0 %v1515_v11  ;;  %1052 = vmatprep.subr.bf16.mxu1 %v1520_v12  ;;  %v1607_v11 = vld [vmem:[%s2073_s1 + $0x3f4] ss:$8 sps:$4 sm:$0xff]   ;;  %v1602_v12 = vld [vmem:[%s2073_s1 + $0x1f0] ss:$8 sps:$4 sm:$0xff]  }
  0x49   : > { %1138 = vmatprep.subr.bf16.mxu0 %v1523_v13  ;;  %1082 = vmatprep.mubr.bf16.mxu1 %v1255_v40  ;;  %v1605_v13 = vld [vmem:[%s2073_s1 + $0x3f0] ss:$8 sps:$4 sm:$0xff]  }
  0x4a   : > { %1168 = vmatprep.mubr.bf16.mxu0 %v1259_v43 }
  0x4b   : > { %1053 = vmatpush1.bf16.msra.mxu1 %v1518_v14  ;;  %v1254_v14 = vcombine.low %v1929_v34, %v1932_v35 }
  0x4c   : > { %1139 = vmatpush1.bf16.msra.mxu0 %v1521_v15  ;;  %1054 = vmatprep.subr.bf16.mxu1 %v1526_v16  ;;  %v1258_v15 = vcombine.low %v1935_v36, %v1938_v37  ;;  %v317_v16 = vlaneseq }
  0x4d   : > { %1140 = vmatprep.subr.bf16.mxu0 %v1529_v17 }
  0x4e   : > { %v318_v17 = vshrl.u32 %v317_v16, 7 }
  0x4f   : > { %1055 = vmatpush1.bf16.msra.mxu1 %v1524_v18 }
  0x50   : > { %1141 = vmatpush1.bf16.msra.mxu0 %v1527_v19  ;;  %1056 = vmatprep.subr.bf16.mxu1 %v1532_v20  ;;  %v319_v18 = vsub.s32 0, %v318_v17  ;;  %v315_v19 = vld [vmem:[%s2074_s2] sm:$0x3]  ;;  %v323_v20 = vsub.s32 1, %v318_v17 }
  0x51   : > { %1142 = vmatprep.subr.bf16.mxu0 %v1535_v21 }
  0x52   : > { %v320_v21 = vrot.slane %v315_v19, %v319_v18 }
  0x53   : > { %1057 = vmatpush1.bf16.msra.mxu1 %v1530_v22  ;;  %v324_v22 = vrot.slane %v315_v19, %v323_v20 }
  0x54   : > { %1143 = vmatpush1.bf16.msra.mxu0 %v1533_v23  ;;  %1058 = vmatprep.subr.bf16.mxu1 %v1538_v24 }
  0x55   : > { %1144 = vmatprep.subr.bf16.mxu0 %v1541_v25 }
  0x57   : > { %1059 = vmatpush1.bf16.msra.mxu1 %v1536_v26 }
  0x58   : > { %1145 = vmatpush1.bf16.msra.mxu0 %v1539_v27  ;;  %1060 = vmatprep.subr.bf16.mxu1 %v1544_v28 }
  0x59   : > { %1146 = vmatprep.subr.bf16.mxu0 %v1547_v29 }
  0x5b   : > { %1061 = vmatpush1.bf16.msra.mxu1 %v1542_v30 }
  0x5c   : > { %1147 = vmatpush1.bf16.msra.mxu0 %v1545_v31  ;;  %1062 = vmatprep.subr.bf16.mxu1 %v1550_v32 }
  0x5d   : > { %1148 = vmatprep.subr.bf16.mxu0 %v1553_v33 }
  0x5f   : > { %1063 = vmatpush1.bf16.msra.mxu1 %v1548_v38 }
  0x60   : > { %1149 = vmatpush1.bf16.msra.mxu0 %v1551_v39  ;;  %1064 = vmatprep.subr.bf16.mxu1 %v1556_v41 }
  0x61   : > { %1150 = vmatprep.subr.bf16.mxu0 %v1559_v42 }
  0x63   : > { %1065 = vmatpush1.bf16.msra.mxu1 %v1554_v44 }
  0x64   : > { %1151 = vmatpush1.bf16.msra.mxu0 %v1557_v45  ;;  %1066 = vmatprep.subr.bf16.mxu1 %v1562_v46 }
  0x65   : > { %1152 = vmatprep.subr.bf16.mxu0 %v1565_v47 }
  0x67   : > { %1067 = vmatpush1.bf16.msra.mxu1 %v1560_v48 }
  0x68   : > { %1153 = vmatpush1.bf16.msra.mxu0 %v1563_v49  ;;  %1068 = vmatprep.subr.bf16.mxu1 %v1568_v50 }
  0x69   : > { %1154 = vmatprep.subr.bf16.mxu0 %v1571_v51 }
  0x6b   : > { %1069 = vmatpush1.bf16.msra.mxu1 %v1566_v52 }
  0x6c   : > { %1155 = vmatpush1.bf16.msra.mxu0 %v1569_v53  ;;  %1070 = vmatprep.subr.bf16.mxu1 %v1574_v54 }
  0x6d   : > { %1156 = vmatprep.subr.bf16.mxu0 %v1577_v55 }
  0x6f   : > { %1071 = vmatpush1.bf16.msra.mxu1 %v1572_v56 }
  0x70   : > { %1157 = vmatpush1.bf16.msra.mxu0 %v1575_v57  ;;  %1072 = vmatprep.subr.bf16.mxu1 %v1580_v58 }
  0x71   : > { %1158 = vmatprep.subr.bf16.mxu0 %v1583_v59 }
  0x73   : > { %1073 = vmatpush1.bf16.msra.mxu1 %v1578_v60 }
  0x74   : > { %1159 = vmatpush1.bf16.msra.mxu0 %v1581_v61  ;;  %1074 = vmatprep.subr.bf16.mxu1 %v1586_v62 }
  0x75   : > { %1160 = vmatprep.subr.bf16.mxu0 %v1589_v63 }
  0x77   : > { %1075 = vmatpush1.bf16.msra.mxu1 %v1584_v0 }
  0x78   : > { %1161 = vmatpush1.bf16.msra.mxu0 %v1587_v1  ;;  %1076 = vmatprep.subr.bf16.mxu1 %v1592_v2 }
  0x79   : > { %1162 = vmatprep.subr.bf16.mxu0 %v1595_v3 }
  0x7b   : > { %1077 = vmatpush1.bf16.msra.mxu1 %v1590_v4 }
  0x7c   : > { %1163 = vmatpush1.bf16.msra.mxu0 %v1593_v5  ;;  %1078 = vmatprep.subr.bf16.mxu1 %v1598_v6 }
  0x7d   : > { %1164 = vmatprep.subr.bf16.mxu0 %v1601_v7 }
  0x7f   : > { %1079 = vmatpush1.bf16.msra.mxu1 %v1596_v8 }
  0x80   : > { %1165 = vmatpush1.bf16.msra.mxu0 %v1599_v9  ;;  %1080 = vmatprep.subr.bf16.mxu1 %v1604_v10 }
  0x81   : > { %1166 = vmatprep.subr.bf16.mxu0 %v1607_v11 }
  0x83   : > { %1081 = vmatpush1.bf16.msra.mxu1 %v1602_v12 }
  0x84   : > { %1167 = vmatpush1.bf16.msra.mxu0 %v1605_v13 }
  0x86   : > { %1083 = vmatmul.mubr.bf16.vlgmr.msra.gmra.mrb[0].mxu1 %v1254_v14 }
  0x87   : > { %1169 = vmatmul.mubr.bf16.vlgmr.msra.gmra.mrb[0].mxu0 %v1258_v15 }
 0x159   : > { %v1084_v23 = vpop.f32.mrb[0].mxu1 }
 0x15a   : > { %v1170_v24 = vpop.f32.mrb[0].mxu0  ;;  %v1392_v25 = vadd.f32 %v1084_v23, %v320_v21  ;;  %v1086_v26 = vpop.f32.mrb[1].mxu1 }
 0x15b   : > { %v1172_v27 = vpop.f32.mrb[1].mxu0  ;;  %v1394_v28 = vadd.f32 %v1086_v26, %v324_v22  ;;  %v1088_v29 = vpop.f32.mrb[2].mxu1 }
 0x15c   : > { %v1174_v30 = vpop.f32.mrb[2].mxu0  ;;  %v1393_v31 = vadd.f32 %v1392_v25, %v1170_v24  ;;  %v1396_v32 = vadd.f32 %v1088_v29, %v320_v21  ;;  %v1090_v33 = vpop.f32.mrb[3].mxu1 }
 0x15d   : > { %v1176_v34 = vpop.f32.mrb[3].mxu0  ;;  %v1395_v35 = vadd.f32 %v1394_v28, %v1172_v27  ;;  %v1398_v36 = vadd.f32 %v1090_v33, %v324_v22 }
 0x15e   : > { %1179 = vst [vmem:[%s177_s4] sm:$0xff] %v1393_v31  ;;  %v1397_v37 = vadd.f32 %v1396_v32, %v1174_v30 }
 0x15f   : > { %1180 = vst [vmem:[%s177_s4 + $0x8] sm:$0xff] %v1395_v35  ;;  %v1399_v38 = vadd.f32 %v1398_v36, %v1176_v34 }
 0x160   : > { %1181 = vst [vmem:[%s177_s4 + $0x10] sm:$0xff] %v1397_v37 }
 0x161   : > { %1182 = vst [vmem:[%s177_s4 + $0x18] sm:$0xff] %v1399_v38 }
 0x162 PF: > { %s13_s12 = sadd.s32 1, %s1614_s12  }
 0x163   : > { %p10_p4 = scmp.ge.s32.totalorder %s13_s12, 4  }
 0x165   :  { %12 = sbr.rel (!%p10_p4) target bundleno = 1 (0x1), region = 62 }

</bundles_post_ra>
